<compile_context>
chip_gen: v6e
topology: v6e:2x2x1
jax: 0.10.0
libtpu: 0.0.40
codegen_flags: <defaults>
</compile_context>

<pallas_src>
import math
import jax
import jax.numpy as jnp
from jax.experimental import pallas as pl
from jax.experimental.pallas import tpu as pltpu


def _round_up(x, m):
    return ((x + m - 1) // m) * m


def _make_kernel(n_stack):
    """n_stack = number of stacked (F_pad, F_pad) linears after the first Linear."""

    def kernel(x_ref, off_ref, coeff_ref, w0_ref, b_ref, ws_ref, o_ref):
        # Gaussian RBF expansion: (TILE_B, 1) -> (TILE_B, n_rbf_pad)
        x = x_ref[...]                                   # (TILE_B, 1)
        diff = x - off_ref[...]                          # broadcast -> (TILE_B, n_rbf_pad)
        h = jnp.exp(coeff_ref[...] * diff * diff)

        b_all = b_ref[...]                               # (n_stack + 1, F_pad)

        # First Linear + ReLU
        h = jnp.dot(h, w0_ref[...], preferred_element_type=jnp.float32)
        h = jnp.maximum(h + b_all[0:1, :], 0.0)

        # Hidden Linears (+ReLU), final Linear (no ReLU)
        for i in range(n_stack):
            w = ws_ref[i]                                # (F_pad, F_pad), static index
            h = jnp.dot(h, w, preferred_element_type=jnp.float32) + b_all[i + 1:i + 2, :]
            if i < n_stack - 1:
                h = jnp.maximum(h, 0.0)

        o_ref[...] = h

    return kernel


class ScalarConditionEmbeddingPallas:
    MAX_TILE_B = 512  # sweep 512-2048 for production batches; per-tile VMEM is tiny

    def __init__(self, condition_name, condition_min, condition_max,
                 grid_spacing, n_features, n_layers, key):
        assert n_layers >= 1, "build_mlp requires fc_num_layers >= 1"
        self.condition_name = condition_name
        self.n_features = n_features

        n_rbf = math.ceil((condition_max - condition_min) / grid_spacing) + 1
        if n_rbf < 2:
            raise ValueError("ScalarConditionEmbedding needs n_rbf >= 2 "
                             "(condition_max must exceed condition_min).")
        cutoff = condition_min + grid_spacing * (n_rbf - 1)
        self.n_rbf = n_rbf
        self.n_rbf_pad = _round_up(n_rbf, 128)
        self.f_pad = _round_up(n_features, 128)

        offsets = jnp.linspace(condition_min, cutoff, n_rbf, dtype=jnp.float32)
        width = jnp.abs(offsets[1] - offsets[0])
        coeff = (-0.5 / (width * width)) * jnp.ones((n_rbf,), jnp.float32)
        self._offsets = offsets
        self._coeff = coeff

        # Padded RBF params: padded lanes get offset 0 and a finite negative coeff
        # so exp() stays finite; the corresponding W0 rows are zero -> no effect.
        self.offsets_pad = (jnp.zeros((1, self.n_rbf_pad), jnp.float32)
                            .at[0, :n_rbf].set(offsets))
        self.coeff_pad = (jnp.full((1, self.n_rbf_pad), -1.0, jnp.float32)
                          .at[0, :n_rbf].set(coeff))

        # build_mlp(in=n_rbf, hidden=h, fc_num_layers=n_layers, out=h):
        #   Linear(n_rbf,h)+ReLU, (n_layers-1)x[Linear(h,h)+ReLU], Linear(h,h)
        dims = [n_rbf] + [n_features] * n_layers + [n_features]
        self.weights, self.biases = [], []
        for i in range(len(dims) - 1):
            fan_in, fan_out = dims[i], dims[i + 1]
            key, kw, kb = jax.random.split(key, 3)
            bound = 1.0 / math.sqrt(fan_in)
            self.weights.append(jax.random.uniform(
                kw, (fan_in, fan_out), jnp.float32, -bound, bound))
            self.biases.append(jax.random.uniform(
                kb, (fan_out,), jnp.float32, -bound, bound))
        self.n_linear = len(self.weights)      # n_layers + 1
        self.n_stack = self.n_linear - 1       # number of (h,h) layers

        # Zero-padded, stacked kernel parameters (lane-dense 128-wide).
        w0 = jnp.zeros((self.n_rbf_pad, self.f_pad), jnp.float32)
        self.w0_pad = w0.at[:n_rbf, :n_features].set(self.weights[0])

        ws = jnp.zeros((self.n_stack, self.f_pad, self.f_pad), jnp.float32)
        for i in range(self.n_stack):
            ws = ws.at[i, :n_features, :n_features].set(self.weights[i + 1])
        self.ws_pad = ws

        bs = jnp.zeros((self.n_linear, self.f_pad), jnp.float32)
        for i in range(self.n_linear):
            bs = bs.at[i, :n_features].set(self.biases[i])
        self.bs_pad = bs

    def __call__(self, inputs):
        x = jnp.asarray(inputs[self.condition_name], dtype=jnp.float32).reshape(-1)
        batch = x.shape[0]

        tile_b = min(self.MAX_TILE_B, _round_up(batch, 8))
        b_pad = _round_up(batch, tile_b)
        x2d = jnp.zeros((b_pad, 1), jnp.float32).at[:batch, 0].set(x)

        n_rbf_pad, f_pad = self.n_rbf_pad, self.f_pad
        n_linear, n_stack = self.n_linear, self.n_stack

        out = pl.pallas_call(
            _make_kernel(n_stack),
            out_shape=jax.ShapeDtypeStruct((b_pad, f_pad), jnp.float32),
            grid=(b_pad // tile_b,),
            in_specs=[
                # batch-tiled input, pipelined across the grid
                pl.BlockSpec((tile_b, 1), lambda i: (i, 0)),
                # resident RBF params and weights (constant index maps)
                pl.BlockSpec((1, n_rbf_pad), lambda i: (0, 0)),
                pl.BlockSpec((1, n_rbf_pad), lambda i: (0, 0)),
                pl.BlockSpec((n_rbf_pad, f_pad), lambda i: (0, 0)),
                pl.BlockSpec((n_linear, f_pad), lambda i: (0, 0)),
                pl.BlockSpec((n_stack, f_pad, f_pad), lambda i: (0, 0, 0)),
            ],
            out_specs=pl.BlockSpec((tile_b, f_pad), lambda i: (i, 0)),
            compiler_params=pltpu.CompilerParams(
                dimension_semantics=("parallel",),       # megacore sharding on v7x
                vmem_limit_bytes=32 * 1024 * 1024,       # explicit budget, v7x-safe
            ),
        )(x2d, self.offsets_pad, self.coeff_pad, self.w0_pad, self.bs_pad, self.ws_pad)

        return out[:batch, :self.n_features]

    # pure-JAX reference (unpadded parameters) for verification
    def reference(self, inputs):
        x = jnp.asarray(inputs[self.condition_name], dtype=jnp.float32).reshape(-1)
        diff = x[:, None] - self._offsets
        h = jnp.exp(self._coeff * diff * diff)
        for i, (w, b) in enumerate(zip(self.weights, self.biases)):
            h = h @ w + b
            if i < self.n_linear - 1:
                h = jnp.maximum(h, 0.0)
        return h


if __name__ == "__main__":
    key = jax.random.PRNGKey(0)
    key, k_param, k_x = jax.random.split(key, 3)

    # small config: cond range [0, 10], spacing 1.0 -> n_rbf = 11
    module = ScalarConditionEmbeddingPallas(
        condition_name="formation_energy",
        condition_min=0.0,
        condition_max=10.0,
        grid_spacing=1.0,
        n_features=32,
        n_layers=2,
        key=k_param,
    )

    batch = 8
    x = jax.random.uniform(k_x, (batch,), jnp.float32, 0.0, 10.0)
    inputs = {"formation_energy": x}

    out = module(inputs)
    out = jax.block_until_ready(out)

    ref = module.reference(inputs)
    assert out.shape == (batch, 32)
    assert jnp.allclose(out, ref, atol=1e-5, rtol=1e-5)

    print("KERNEL_OK")
</pallas_src>

<mosaic_0001>
module attributes {stable_mosaic.version = 11 : i64} {
  func.func @kernel(%arg0: i32, %arg1: memref<8x1xf32, #tpu.memory_space<vmem>>, %arg2: memref<1x128xf32, #tpu.memory_space<vmem>>, %arg3: memref<1x128xf32, #tpu.memory_space<vmem>>, %arg4: memref<128x128xf32, #tpu.memory_space<vmem>>, %arg5: memref<3x128xf32, #tpu.memory_space<vmem>>, %arg6: memref<2x128x128xf32, #tpu.memory_space<vmem>>, %arg7: memref<8x128xf32, #tpu.memory_space<vmem>>) attributes {dimension_semantics = [#tpu.dimension_semantics<parallel>], iteration_bounds = array<i64: 1>, scalar_prefetch = 0 : i64, scratch_operands = 0 : i64, tpu.core_type = #tpu.core_type<tc>, window_params = [{transform_indices = @transform_0, window_bounds = array<i64: 8, 1>}, {pipeline_mode = #tpu.pipeline_mode<synchronous>, transform_indices = @transform_1, window_bounds = array<i64: 1, 128>}, {pipeline_mode = #tpu.pipeline_mode<synchronous>, transform_indices = @transform_2, window_bounds = array<i64: 1, 128>}, {pipeline_mode = #tpu.pipeline_mode<synchronous>, transform_indices = @transform_3, window_bounds = array<i64: 128, 128>}, {pipeline_mode = #tpu.pipeline_mode<synchronous>, transform_indices = @transform_4, window_bounds = array<i64: 3, 128>}, {pipeline_mode = #tpu.pipeline_mode<synchronous>, transform_indices = @transform_5, window_bounds = array<i64: 2, 128, 128>}, {transform_indices = @transform_6, window_bounds = array<i64: 8, 128>}]} {
    %c0 = arith.constant 0 : index
    %c0_0 = arith.constant 0 : index
    %0 = vector.load %arg1[%c0, %c0_0] : memref<8x1xf32, #tpu.memory_space<vmem>>, vector<8x1xf32>
    %c0_1 = arith.constant 0 : index
    %c0_2 = arith.constant 0 : index
    %1 = vector.load %arg2[%c0_1, %c0_2] : memref<1x128xf32, #tpu.memory_space<vmem>>, vector<1x128xf32>
    %2 = vector.broadcast %0 : vector<8x1xf32> to vector<8x128xf32>
    %3 = vector.broadcast %1 : vector<1x128xf32> to vector<8x128xf32>
    %4 = arith.subf %2, %3 : vector<8x128xf32>
    %c0_3 = arith.constant 0 : index
    %c0_4 = arith.constant 0 : index
    %5 = vector.load %arg3[%c0_3, %c0_4] : memref<1x128xf32, #tpu.memory_space<vmem>>, vector<1x128xf32>
    %6 = vector.broadcast %5 : vector<1x128xf32> to vector<8x128xf32>
    %7 = arith.mulf %6, %4 : vector<8x128xf32>
    %8 = arith.mulf %7, %4 : vector<8x128xf32>
    %9 = math.exp %8 : vector<8x128xf32>
    %c0_5 = arith.constant 0 : index
    %c0_6 = arith.constant 0 : index
    %10 = vector.load %arg5[%c0_5, %c0_6] : memref<3x128xf32, #tpu.memory_space<vmem>>, vector<3x128xf32>
    %c0_7 = arith.constant 0 : index
    %c0_8 = arith.constant 0 : index
    %11 = vector.load %arg4[%c0_7, %c0_8] : memref<128x128xf32, #tpu.memory_space<vmem>>, vector<128x128xf32>
    %cst = arith.constant dense<0.000000e+00> : vector<8x128xf32>
    %12 = tpu.matmul %9, %11, %cst {dimension_numbers = #tpu.dot_dimension_numbers<[1], [0], [0], [1], [0, 0, 1, 1], [], []>} : vector<8x128xf32>, vector<128x128xf32>, vector<8x128xf32> -> vector<8x128xf32>
    %13 = vector.extract_strided_slice %10 {offsets = [0, 0], sizes = [1, 128], strides = [1, 1]} : vector<3x128xf32> to vector<1x128xf32>
    %14 = vector.broadcast %13 : vector<1x128xf32> to vector<8x128xf32>
    %15 = arith.addf %12, %14 : vector<8x128xf32>
    %cst_9 = arith.constant 0.000000e+00 : f32
    %16 = vector.broadcast %cst_9 : f32 to vector<8x128xf32>
    %17 = arith.maximumf %15, %16 : vector<8x128xf32>
    %c0_10 = arith.constant 0 : index
    %c0_11 = arith.constant 0 : index
    %c0_12 = arith.constant 0 : index
    %18 = vector.load %arg6[%c0_10, %c0_11, %c0_12] : memref<2x128x128xf32, #tpu.memory_space<vmem>>, vector<1x128x128xf32>
    %19 = vector.shape_cast %18 : vector<1x128x128xf32> to vector<128x128xf32>
    %cst_13 = arith.constant dense<0.000000e+00> : vector<8x128xf32>
    %20 = tpu.matmul %17, %19, %cst_13 {dimension_numbers = #tpu.dot_dimension_numbers<[1], [0], [0], [1], [0, 0, 1, 1], [], []>} : vector<8x128xf32>, vector<128x128xf32>, vector<8x128xf32> -> vector<8x128xf32>
    %21 = vector.extract_strided_slice %10 {offsets = [1, 0], sizes = [1, 128], strides = [1, 1]} : vector<3x128xf32> to vector<1x128xf32>
    %22 = vector.broadcast %21 : vector<1x128xf32> to vector<8x128xf32>
    %23 = arith.addf %20, %22 : vector<8x128xf32>
    %cst_14 = arith.constant 0.000000e+00 : f32
    %24 = vector.broadcast %cst_14 : f32 to vector<8x128xf32>
    %25 = arith.maximumf %23, %24 : vector<8x128xf32>
    %c1 = arith.constant 1 : index
    %c0_15 = arith.constant 0 : index
    %c0_16 = arith.constant 0 : index
    %26 = vector.load %arg6[%c1, %c0_15, %c0_16] : memref<2x128x128xf32, #tpu.memory_space<vmem>>, vector<1x128x128xf32>
    %27 = vector.shape_cast %26 : vector<1x128x128xf32> to vector<128x128xf32>
    %cst_17 = arith.constant dense<0.000000e+00> : vector<8x128xf32>
    %28 = tpu.matmul %25, %27, %cst_17 {dimension_numbers = #tpu.dot_dimension_numbers<[1], [0], [0], [1], [0, 0, 1, 1], [], []>} : vector<8x128xf32>, vector<128x128xf32>, vector<8x128xf32> -> vector<8x128xf32>
    %29 = vector.extract_strided_slice %10 {offsets = [2, 0], sizes = [1, 128], strides = [1, 1]} : vector<3x128xf32> to vector<1x128xf32>
    %30 = vector.broadcast %29 : vector<1x128xf32> to vector<8x128xf32>
    %31 = arith.addf %28, %30 : vector<8x128xf32>
    %c0_18 = arith.constant 0 : index
    %c0_19 = arith.constant 0 : index
    %32 = vector.load %arg7[%c0_18, %c0_19] : memref<8x128xf32, #tpu.memory_space<vmem>>, vector<8x128xf32>
    tpu.vector_store %arg7[%c0_18, %c0_19], %31 {strides = array<i32>} : memref<8x128xf32, #tpu.memory_space<vmem>>, vector<8x128xf32>,
    return
  }
  func.func @transform_0(%arg0: i32) -> (i32, i32) {
    %c0_i32 = arith.constant 0 : i32
    %c0_i32_0 = arith.constant 0 : i32
    return %arg0, %c0_i32 : i32, i32
  }
  func.func @transform_1(%arg0: i32) -> (i32, i32) {
    %c0_i32 = arith.constant 0 : i32
    %c0_i32_0 = arith.constant 0 : i32
    %c0_i32_1 = arith.constant 0 : i32
    return %c0_i32, %c0_i32_0 : i32, i32
  }
  func.func @transform_2(%arg0: i32) -> (i32, i32) {
    %c0_i32 = arith.constant 0 : i32
    %c0_i32_0 = arith.constant 0 : i32
    %c0_i32_1 = arith.constant 0 : i32
    return %c0_i32, %c0_i32_0 : i32, i32
  }
  func.func @transform_3(%arg0: i32) -> (i32, i32) {
    %c0_i32 = arith.constant 0 : i32
    %c0_i32_0 = arith.constant 0 : i32
    %c0_i32_1 = arith.constant 0 : i32
    return %c0_i32, %c0_i32_0 : i32, i32
  }
  func.func @transform_4(%arg0: i32) -> (i32, i32) {
    %c0_i32 = arith.constant 0 : i32
    %c0_i32_0 = arith.constant 0 : i32
    %c0_i32_1 = arith.constant 0 : i32
    return %c0_i32, %c0_i32_0 : i32, i32
  }
  func.func @transform_5(%arg0: i32) -> (i32, i32, i32) {
    %c0_i32 = arith.constant 0 : i32
    %c0_i32_0 = arith.constant 0 : i32
    %c0_i32_1 = arith.constant 0 : i32
    %c0_i32_2 = arith.constant 0 : i32
    return %c0_i32, %c0_i32_0, %c0_i32_1 : i32, i32, i32
  }
  func.func @transform_6(%arg0: i32) -> (i32, i32) {
    %c0_i32 = arith.constant 0 : i32
    %c0_i32_0 = arith.constant 0 : i32
    return %arg0, %c0_i32 : i32, i32
  }
}

</mosaic_0001>

<bundles_post_ra>
// kernel: tpu_custom_call.1
= control target key start
LH: loop header
LB: loop body
LE: loop exit
PB: predicated region body
PF: predicated region fallthrough
CT: control target
= control target key end

     0   :  { %11 = vsyncpa [#allocation3], 0  ;;  %s721_s0 = inlined_call_operand.vmem [shape: f32[8,1], index: 0, kind: input, shape index: {}]   ;;  %s722_s1 = inlined_call_operand.vmem [shape: f32[1,128], index: 1, kind: input, shape index: {}]   ;;  %s723_s2 = inlined_call_operand.vmem [shape: f32[1,128], index: 2, kind: input, shape index: {}]   ;;  %s724_s3 = inlined_call_operand.hbm [shape: f32[128,128], index: 3, kind: input, shape index: {}]   ;;  %s725_s4 = inlined_call_operand.vmem [shape: f32[3,128], index: 4, kind: input, shape index: {}]   ;;  %s726_s5 = inlined_call_operand.hbm [shape: f32[2,128,128], index: 5, kind: input, shape index: {}]   ;;  %s727_s6 = inlined_call_operand.hbm [shape: f32[8,128], index: 6, kind: output, shape index: {}]  }
   0x1   :  { %12 = vsyncpa [#allocation6], 0 }
   0x2   :  { %13 = vsyncpa [#allocation4], 0  ;;  %s603_s21 = smov [#allocation2]  }
   0x3   :  { %s25_s22 = sshll.u32 %s603_s21, 4  ;;  %s26_s22 = int_to_ptr.vmem [resolvable:$true] %s25_s22 }
   0x4   :  { %s545_s23 = scalar_lea.vmem %s26_s22, 2048  ;;  %p550_p1 = scmp.lt.s32.totalorder %s26_s22, %s26_s22 }
   0x5   :  { %p546_p0 = scmp.ne.s32.totalorder %s26_s22, %s545_s23  ;;  %p551_p2 = scmp.lt.s32.totalorder %s545_s23, %s545_s23 }
   0x7   :  { %p552_p3 = por %p551_p2, %p550_p1 }
   0x9   :  { %p553_p4 = pnand %p552_p3, %p546_p0 }
   0xb   :  { %556 = shalt.err (!%p553_p4)
}
   0xc   :  { %s604_s24 = smov 128   ;;  %s605_s25 = smov 8  }
   0xd   :  { %31 = dma.hbm_to_vmem [thread:$0]  %s724_s3, 2048, %s26_s22, [#allocation3], %s604_s24, %s604_s24, %s605_s25  }
   0xe   :  { %s606_s28 = smov [#allocation5]  }
   0xf   :  { %s39_s29 = sshll.u32 %s606_s28, 4  ;;  %s40_s29 = int_to_ptr.vmem [resolvable:$true] %s39_s29 }
  0x10   :  { %s565_s30 = scalar_lea.vmem %s40_s29, 4096  ;;  %p570_p6 = scmp.lt.s32.totalorder %s40_s29, %s40_s29 }
  0x11   :  { %p566_p5 = scmp.ne.s32.totalorder %s40_s29, %s565_s30  ;;  %p571_p7 = scmp.lt.s32.totalorder %s565_s30, %s565_s30 }
  0x13   :  { %p572_p8 = por %p571_p7, %p570_p6 }
  0x15   :  { %p573_p9 = pnand %p572_p8, %p566_p5 }
  0x17   :  { %576 = shalt.err (!%p573_p9)
}
  0x18   :  { %45 = dma.hbm_to_vmem [thread:$0]  %s726_s5, 4096, %s40_s29, [#allocation6], %s604_s24, %s604_s24, %s605_s25  }
  0x19   :  { %597 = dma.done.wait [#allocation3], 2048  }
  0x1a   :  { %598 = vsyncadd [#allocation3], 4294965248 }
  0x1b   :  { %599 = dma.done.wait [#allocation6], 4096  }
  0x1c   :  { %600 = vsyncadd [#allocation6], 4294963200  ;;  %v607_v0 = vmov 0   ;;  %v608_v1 = vmov 0.0   ;;  %v52_v2 = vld [vmem:[%s721_s0] sm:$0xff]  ;;  %v93_v3 = vld [vmem:[#allocation2 + $0x78] sm:$0xff]  ;;  %v94_v56 = vlaneseq }
  0x1d   :  { %534 = vset.pattern.permute.xlu0 %v607_v0  ;;  %421 = vmatprep.subr.mxu0 %v608_v1  ;;  %v92_v4 = vld [vmem:[#allocation2 + $0x70] sm:$0xff]  ;;  %v91_v5 = vld [vmem:[#allocation2 + $0x68] sm:$0xff]  ;;  %v90_v6 = vld [vmem:[#allocation2 + $0x60] sm:$0xff]  ;;  %vm609_vm0 = vmmov 0  }
  0x1e   :  { %456 = vmatprep.subr.mxu1 %v608_v1  ;;  %56 = vperm.xlu0 %534, %v52_v2   ;;  %v89_v7 = vld [vmem:[#allocation2 + $0x58] sm:$0xff]  ;;  %v88_v8 = vld [vmem:[#allocation2 + $0x50] sm:$0xff]  ;;  %v87_v9 = vld [vmem:[#allocation2 + $0x48] sm:$0xff]  ;;  %v95_v57 = vshrl.u32 %v94_v56, 7 }
  0x1f   :  { %422 = vmatpush3.msra.mxu0 %v93_v3  ;;  %453 = vmatprep.mubr.msk.f32.mxu0 %vm609_vm0, %v608_v1  ;;  %v86_v10 = vld [vmem:[#allocation2 + $0x40] sm:$0xff]  ;;  %v85_v11 = vld [vmem:[#allocation2 + $0x38] sm:$0xff]  ;;  %v84_v12 = vld [vmem:[#allocation2 + $0x30] sm:$0xff] }
  0x20   :  { %423 = vmatprep.subr.mxu0 %v608_v1  ;;  %488 = vmatprep.mubr.msk.f32.mxu1 %vm609_vm0, %v608_v1  ;;  %v83_v13 = vld [vmem:[#allocation2 + $0x28] sm:$0xff]  ;;  %v184_v14 = vld [vmem:[#allocation5 + $0x78] sm:$0xff]  ;;  %v183_v15 = vld [vmem:[#allocation5 + $0x70] sm:$0xff]  ;;  %v96_v58 = vsub.s32 0, %v95_v57 }
  0x21   :  { %424 = vmatpush3.msra.mxu0 %v92_v4  ;;  %v82_v16 = vld [vmem:[#allocation2 + $0x20] sm:$0xff]  ;;  %457 = vmatpush3.msra.mxu1 %v184_v14  ;;  %v182_v17 = vld [vmem:[#allocation5 + $0x68] sm:$0xff]  ;;  %v81_v18 = vld [vmem:[#allocation2 + $0x18] sm:$0xff] }
  0x22   :  { %425 = vmatprep.subr.mxu0 %v608_v1  ;;  %458 = vmatprep.subr.mxu1 %v608_v1  ;;  %v181_v19 = vld [vmem:[#allocation5 + $0x60] sm:$0xff]  ;;  %v80_v20 = vld [vmem:[#allocation2 + $0x10] sm:$0xff]  ;;  %v180_v21 = vld [vmem:[#allocation5 + $0x58] sm:$0xff] }
  0x23   :  { %426 = vmatpush3.msra.mxu0 %v91_v5  ;;  %459 = vmatpush3.msra.mxu1 %v183_v15  ;;  %v79_v22 = vld [vmem:[#allocation2 + $0x8] sm:$0xff]  ;;  %v179_v23 = vld [vmem:[#allocation5 + $0x50] sm:$0xff]  ;;  %v78_v24 = vld [vmem:[#allocation2] sm:$0xff]  ;;  %v187_v5 = vsub.s32 1, %v95_v57 }
  0x24   :  { %427 = vmatprep.subr.mxu0 %v608_v1  ;;  %460 = vmatprep.subr.mxu1 %v608_v1  ;;  %v178_v25 = vld [vmem:[#allocation5 + $0x48] sm:$0xff]  ;;  %v177_v26 = vld [vmem:[#allocation5 + $0x40] sm:$0xff]  ;;  %v176_v27 = vld [vmem:[#allocation5 + $0x38] sm:$0xff] }
  0x25   :  { %428 = vmatpush3.msra.mxu0 %v90_v6  ;;  %461 = vmatpush3.msra.mxu1 %v182_v17  ;;  %v175_v28 = vld [vmem:[#allocation5 + $0x30] sm:$0xff]  ;;  %v174_v29 = vld [vmem:[#allocation5 + $0x28] sm:$0xff]  ;;  %v173_v30 = vld [vmem:[#allocation5 + $0x20] sm:$0xff] }
  0x26   :  { %429 = vmatprep.subr.mxu0 %v608_v1  ;;  %462 = vmatprep.subr.mxu1 %v608_v1  ;;  %v172_v31 = vld [vmem:[#allocation5 + $0x18] sm:$0xff]  ;;  %v368_v32 = vld [vmem:[%s722_s1] ss:$0 sm:$0xff]  ;;  %v171_v40 = vld [vmem:[#allocation5 + $0x10] sm:$0xff] }
  0x27   :  { %430 = vmatpush3.msra.mxu0 %v89_v7  ;;  %463 = vmatpush3.msra.mxu1 %v181_v19  ;;  %v369_v33 = vld [vmem:[%s723_s2] ss:$0 sm:$0xff]  ;;  %v170_v41 = vld [vmem:[#allocation5 + $0x8] sm:$0xff]  ;;  %v276_v43 = vld [vmem:[#allocation5 + $0xf8] sm:$0xff] }
  0x28   :  { %431 = vmatprep.subr.mxu0 %v608_v1  ;;  %464 = vmatprep.subr.mxu1 %v608_v1  ;;  %v169_v42 = vld [vmem:[#allocation5] sm:$0xff]  ;;  %v275_v44 = vld [vmem:[#allocation5 + $0xf0] sm:$0xff]  ;;  %v274_v45 = vld [vmem:[#allocation5 + $0xe8] sm:$0xff] }
  0x29   :  { %432 = vmatpush3.msra.mxu0 %v88_v8  ;;  %465 = vmatpush3.msra.mxu1 %v180_v21  ;;  %v273_v46 = vld [vmem:[#allocation5 + $0xe0] sm:$0xff]  ;;  %v272_v47 = vld [vmem:[#allocation5 + $0xd8] sm:$0xff]  ;;  %v271_v48 = vld [vmem:[#allocation5 + $0xd0] sm:$0xff] }
  0x2a   :  { %433 = vmatprep.subr.mxu0 %v608_v1  ;;  %466 = vmatprep.subr.mxu1 %v608_v1  ;;  %v270_v49 = vld [vmem:[#allocation5 + $0xc8] sm:$0xff]  ;;  %v269_v50 = vld [vmem:[#allocation5 + $0xc0] sm:$0xff]  ;;  %v268_v51 = vld [vmem:[#allocation5 + $0xb8] sm:$0xff] }
  0x2b   :  { %434 = vmatpush3.msra.mxu0 %v87_v9  ;;  %467 = vmatpush3.msra.mxu1 %v179_v23  ;;  %v267_v52 = vld [vmem:[#allocation5 + $0xb0] sm:$0xff]  ;;  %v266_v53 = vld [vmem:[#allocation5 + $0xa8] sm:$0xff]  ;;  %v265_v54 = vld [vmem:[#allocation5 + $0xa0] sm:$0xff] }
  0x2c   :  { %435 = vmatprep.subr.mxu0 %v608_v1  ;;  %468 = vmatprep.subr.mxu1 %v608_v1  ;;  %v264_v55 = vld [vmem:[#allocation5 + $0x98] sm:$0xff]  ;;  %v77_v59 = vld [vmem:[%s725_s4] sm:$0x7]  ;;  %v263_v2 = vld [vmem:[#allocation5 + $0x90] sm:$0xff]  ;;  %s610_s4 = smov [#allocation7]  }
  0x2d   :  { %436 = vmatpush3.msra.mxu0 %v86_v10  ;;  %469 = vmatpush3.msra.mxu1 %v178_v25  ;;  %v97_v60 = vrot.slane %v77_v59, %v96_v58  ;;  %v262_v3 = vld [vmem:[#allocation5 + $0x88] sm:$0xff]  ;;  %v261_v4 = vld [vmem:[#allocation5 + $0x80] sm:$0xff]  ;;  %v188_v6 = vrot.slane %v77_v59, %v187_v5  ;;  %s358_s12 = sshll.u32 %s610_s4, 4  ;;  %s359_s12 = int_to_ptr.vmem [resolvable:$true] %s358_s12 }
  0x2e   :  { %437 = vmatprep.subr.mxu0 %v608_v1  ;;  %470 = vmatprep.subr.mxu1 %v608_v1  ;;  %s577_s13 = scalar_lea.vmem %s359_s12, 128  ;;  %p582_p11 = scmp.lt.s32.totalorder %s359_s12, %s359_s12 }
  0x2f   :  { %438 = vmatpush3.msra.mxu0 %v85_v11  ;;  %471 = vmatpush3.msra.mxu1 %v177_v26  ;;  %v279_v11 = vsub.s32 2, %v95_v57  ;;  %p578_p10 = scmp.ne.s32.totalorder %s359_s12, %s577_s13  ;;  %p583_p12 = scmp.lt.s32.totalorder %s577_s13, %s577_s13 }
  0x30   :  { %439 = vmatprep.subr.mxu0 %v608_v1  ;;  %472 = vmatprep.subr.mxu1 %v608_v1 }
  0x31   :  { %440 = vmatpush3.msra.mxu0 %v84_v12  ;;  %473 = vmatpush3.msra.mxu1 %v176_v27  ;;  %v280_v12 = vrot.slane %v77_v59, %v279_v11  ;;  %p584_p13 = por %p583_p12, %p582_p11 }
  0x32   :  { %441 = vmatprep.subr.mxu0 %v608_v1  ;;  %474 = vmatprep.subr.mxu1 %v608_v1 }
  0x33   :  { %442 = vmatpush3.msra.mxu0 %v83_v13  ;;  %475 = vmatpush3.msra.mxu1 %v175_v28  ;;  %p585_p0 = pnand %p584_p13, %p578_p10 }
  0x34   :  { %443 = vmatprep.subr.mxu0 %v608_v1  ;;  %476 = vmatprep.subr.mxu1 %v608_v1 }
  0x35   :  { %444 = vmatpush3.msra.mxu0 %v82_v16  ;;  %477 = vmatpush3.msra.mxu1 %v174_v29 }
  0x36   :  { %445 = vmatprep.subr.mxu0 %v608_v1  ;;  %478 = vmatprep.subr.mxu1 %v608_v1 }
  0x37   :  { %446 = vmatpush3.msra.mxu0 %v81_v18  ;;  %479 = vmatpush3.msra.mxu1 %v173_v30 }
  0x38   :  { %447 = vmatprep.subr.mxu0 %v608_v1  ;;  %480 = vmatprep.subr.mxu1 %v608_v1 }
  0x39   :  { %448 = vmatpush3.msra.mxu0 %v80_v20  ;;  %481 = vmatpush3.msra.mxu1 %v172_v31 }
  0x3a   :  { %449 = vmatprep.subr.mxu0 %v608_v1  ;;  %482 = vmatprep.subr.mxu1 %v608_v1 }
  0x3b   :  { %450 = vmatpush3.msra.mxu0 %v79_v22  ;;  %483 = vmatpush3.msra.mxu1 %v171_v40 }
  0x3c   :  { %451 = vmatprep.subr.mxu0 %v608_v1  ;;  %484 = vmatprep.subr.mxu1 %v608_v1 }
  0x3d   :  { %452 = vmatpush3.msra.mxu0 %v78_v24  ;;  %485 = vmatpush3.msra.mxu1 %v170_v41 }
  0x3e   :  { %491 = vmatprep.subr.mxu0 %v608_v1  ;;  %486 = vmatprep.subr.mxu1 %v608_v1 }
  0x3f   :  { %487 = vmatpush3.msra.mxu1 %v169_v42 }
  0x99   :  { %v57_v34 = vpop.permute.xlu0 %56 }
  0x9a   :  { %v65_v35 = vsub.f32 %v57_v34, %v368_v32 }
  0x9c   :  { %v73_v36 = vmul.f32 %v369_v33, %v65_v35 }
  0x9e   :  { %v74_v37 = vmul.f32 %v73_v36, %v65_v35 }
  0xa0   :  { %v75_v38 = vmul.f32 1.442695, %v74_v37 }
  0xa2   :  { %535 = vpow2.f32 %v75_v38 }
  0xaf   :  { %v536_v39 = vpop.eup %535 }
  0xb0   :  { %454 = vmatmul.mubr.f32.vlgmr.msra.gmra.mxu0 %v536_v39 }
  0xb1   :  { %523 = vmatprep.mubr.msk.f32.mxu0 %vm609_vm0, %v608_v1  ;;  %492 = vmatpush3.msra.mxu0 %v276_v43 }
  0xb2   :  { %493 = vmatprep.subr.mxu0 %v608_v1 }
  0xb3   :  { %494 = vmatpush3.msra.mxu0 %v275_v44 }
  0xb4   :  { %495 = vmatprep.subr.mxu0 %v608_v1 }
  0xb5   :  { %496 = vmatpush3.msra.mxu0 %v274_v45 }
  0xb6   :  { %497 = vmatprep.subr.mxu0 %v608_v1 }
  0xb7   :  { %498 = vmatpush3.msra.mxu0 %v273_v46 }
  0xb8   :  { %499 = vmatprep.subr.mxu0 %v608_v1 }
  0xb9   :  { %500 = vmatpush3.msra.mxu0 %v272_v47 }
  0xba   :  { %501 = vmatprep.subr.mxu0 %v608_v1 }
  0xbb   :  { %502 = vmatpush3.msra.mxu0 %v271_v48 }
  0xbc   :  { %503 = vmatprep.subr.mxu0 %v608_v1 }
  0xbd   :  { %504 = vmatpush3.msra.mxu0 %v270_v49 }
  0xbe   :  { %505 = vmatprep.subr.mxu0 %v608_v1 }
  0xbf   :  { %506 = vmatpush3.msra.mxu0 %v269_v50 }
  0xc0   :  { %507 = vmatprep.subr.mxu0 %v608_v1 }
  0xc1   :  { %508 = vmatpush3.msra.mxu0 %v268_v51 }
  0xc2   :  { %509 = vmatprep.subr.mxu0 %v608_v1 }
  0xc3   :  { %510 = vmatpush3.msra.mxu0 %v267_v52 }
  0xc4   :  { %511 = vmatprep.subr.mxu0 %v608_v1 }
  0xc5   :  { %512 = vmatpush3.msra.mxu0 %v266_v53 }
  0xc6   :  { %513 = vmatprep.subr.mxu0 %v608_v1 }
  0xc7   :  { %514 = vmatpush3.msra.mxu0 %v265_v54 }
  0xc8   :  { %515 = vmatprep.subr.mxu0 %v608_v1 }
  0xc9   :  { %516 = vmatpush3.msra.mxu0 %v264_v55 }
  0xca   :  { %517 = vmatprep.subr.mxu0 %v608_v1 }
  0xcb   :  { %518 = vmatpush3.msra.mxu0 %v263_v2 }
  0xcc   :  { %519 = vmatprep.subr.mxu0 %v608_v1 }
  0xcd   :  { %520 = vmatpush3.msra.mxu0 %v262_v3 }
  0xce   :  { %521 = vmatprep.subr.mxu0 %v608_v1 }
  0xcf   :  { %522 = vmatpush3.msra.mxu0 %v261_v4 }
 0x170   :  { %v164_v61 = vpop.f32.mrf.mxu0 }
 0x171   :  { %v165_v62 = vadd.f32 %v164_v61, %v97_v60 }
 0x172   :  { %v455_v63 = vpop.f32.mrf.mxu0 }
 0x173   :  { %v168_v0 = vmax.f32 %v165_v62, 0.0 }
 0x175   :  { %489 = vmatmul.mubr.f32.vlgmr.msra.gmra.mxu1 %v168_v0 }
 0x235   :  { %v255_v7 = vpop.f32.mrf.mxu1 }
 0x236   :  { %v256_v8 = vadd.f32 %v255_v7, %v188_v6 }
 0x237   :  { %v490_v9 = vpop.f32.mrf.mxu1 }
 0x238   :  { %v259_v10 = vmax.f32 %v256_v8, 0.0 }
 0x23a   :  { %524 = vmatmul.mubr.f32.vlgmr.msra.gmra.mxu0 %v259_v10 }
 0x2fa   :  { %v347_v13 = vpop.f32.mrf.mxu0 }
 0x2fb   :  { %v348_v14 = vadd.f32 %v347_v13, %v280_v12 }
 0x2fc   :  { %v525_v15 = vpop.f32.mrf.mxu0 }
 0x2fd   :  { %351 = vst [vmem:[#allocation7] sm:$0xff] %v348_v14 }
 0x2fe   :  { %588 = shalt.err (!%p585_p0)
}
 0x2ff   :  { %361 = dma.vmem_to_hbm [thread:$0]  %s359_s12, 128, %s727_s6, [#allocation4]  }
 0x300   :  { %601 = dma.done.wait [#allocation4], 128  }
 0x301   :  { %602 = vsyncadd [#allocation4], 4294967168 }
 0x302   :  { %365 = vsyncpa [#allocation3], 1 }
 0x303   :  { %366 = vsyncpa [#allocation6], 1 }
 0x304   :  { %367 = vsyncpa [#allocation4], 1 }

</bundles_post_ra>
